<compile_context>
chip_gen: v7x
topology: tpu7x:2x2x1
jax: 0.10.0
libtpu: 0.0.40
codegen_flags: <defaults>
</compile_context>

<pallas_src>
import functools

import jax
import jax.numpy as jnp
from jax import lax
from jax.experimental import pallas as pl
from jax.experimental.pallas import tpu as pltpu


def _dsconv_kernel(x_ref, w_ref, b_ref, o_ref, *, NB, TH, KH, shift):
    """One (batch-group, N-tile, row-tile) step of the banded conv.

    x_ref: (NB, Hp, W*Cin)   top-padded, lane-dense input (NB batch elements)
    w_ref: (KH, W*Cin, TN)   banded (width-folded) weights, one N tile
    b_ref: (1, TN)           bias tiled across the output width, one N tile
    o_ref: (NB, TH, TN)      output row tile for this batch group / N tile
    """
    t = pl.program_id(2)
    r0 = pl.multiple_of(t * TH, TH)
    M = NB * TH
    TN = o_ref.shape[-1]

    # Accumulator initialised from the bias broadcast (saves a VPU add/step).
    acc = jnp.broadcast_to(b_ref[...].astype(jnp.float32), (M, TN))
    for kh in range(KH):  # KH is tiny (2); static unroll
        # NOTE: the kh>0 read starts at a non-multiple-of-8 sublane; if the
        # Mosaic dump shows an extra VMEM copy, load one aligned
        # (TH+KH-1)-row slab at r0 and slice it in-register instead.
        rows = x_ref[:, pl.ds(r0 + kh, TH), :]            # (NB, TH, W*Cin)
        rows = rows.reshape(M, rows.shape[-1])            # leading-dim merge
        acc = acc + jnp.dot(rows, w_ref[kh],
                            preferred_element_type=jnp.float32)
    o_ref[...] = acc.reshape(NB, TH, TN).astype(o_ref.dtype)

    if shift:  # down_shift: global output row 0 must be exactly zero
        @pl.when(t == 0)
        def _():
            o_ref[:, pl.ds(0, shift), :] = jnp.zeros(
                (NB, shift, TN), o_ref.dtype)


def _round_up(x, m):
    return ((x + m - 1) // m) * m


def _vmem_capacity_bytes():
    """Physical VMEM of the current chip; conservative (v7x) default."""
    try:
        info = pltpu.get_tpu_info()
        for attr in ("vmem_capacity_bytes", "vmem_size_bytes", "vmem_bytes"):
            cap = getattr(info, attr, None)
            if cap:
                return int(cap)
    except Exception:
        pass
    return 64 * 1024 * 1024


def _pick_tiles(B, H, n_pad):
    """Choose (NB, TH, TN): NB|B, TH|H, TN|n_pad, with NB*TH*TN*4 <= ~128KiB."""
    # N tile: largest multiple-of-128 divisor of n_pad, capped at 512.
    tn = 128
    for cand in range(128, min(n_pad, 512) + 1, 128):
        if n_pad % cand == 0:
            tn = cand
    # M target capped so the f32 accumulator stays within the vreg budget.
    m_cap = max(8, min(256, (128 * 1024) // (4 * tn)))
    m_cap = max(8, (m_cap // 8) * 8)
    # TH: largest multiple-of-8 divisor of H under the cap, else full H.
    th = None
    for d in range(8, min(H, m_cap) + 1, 8):
        if H % d == 0:
            th = d
    if th is None:
        th = H  # full dim is always a legal block extent
    # NB: fold batch into M only when the merge is layout-free (TH % 8 == 0).
    nb = 1
    if th % 8 == 0:
        limit = max(1, m_cap // th)
        for d in range(1, B + 1):
            if B % d == 0 and d <= limit:
                nb = d
    return nb, th, tn


def _banded_weights(v, g, bias, *, W, Wo, pad_l, n_pad, compute_dtype):
    """Weight-norm + width-band folding.

    Weight-only (no activations) -> cache per weight update in real use; at
    inference this should be hoisted out of the per-call forward.
    """
    Cout, Cin, KH, KW = v.shape
    v32 = v.astype(jnp.float32)
    v_norm = jnp.sqrt(jnp.sum(v32 * v32, axis=(1, 2, 3)))
    w = v32 * (g.astype(jnp.float32) / v_norm)[:, None, None, None]
    w_hwio = jnp.transpose(w, (2, 3, 1, 0))                 # (KH, KW, Cin, Cout)

    # band[kh, wi, ci, wo, co] = w_hwio[kh, wi-wo+pad_l, ci, co] on-band else 0
    wi = jnp.arange(W)[:, None, None]
    wo = jnp.arange(Wo)[None, :, None]
    kw = jnp.arange(KW)[None, None, :]
    sel = (wi - wo + pad_l == kw).astype(jnp.float32)       # (W, Wo, KW)
    w_band = jnp.einsum("pqk,hkio->hpiqo", sel, w_hwio)     # (KH,W,Cin,Wo,Cout)
    w_band = w_band.reshape(KH, W * Cin, Wo * Cout)

    bias_row = jnp.tile(bias.astype(jnp.float32), (Wo,)).reshape(1, Wo * Cout)

    n = Wo * Cout
    if n_pad != n:  # lane-align N so stores are full, unmasked vst's
        w_band = jnp.pad(w_band, ((0, 0), (0, 0), (0, n_pad - n)))
        bias_row = jnp.pad(bias_row, ((0, 0), (0, n_pad - n)))
    return w_band.astype(compute_dtype), bias_row


def down_shifted_conv2d_forward(x_nchw, v, g, bias, *, filter_size=(2, 3),
                                shift_output_down=False, compute_dtype=None):
    """Forward pass matching the PyTorch module (norm='weight_norm').

    x_nchw: (B, Cin, H, W)
    v:      (Cout, Cin, KH, KW)   weight_norm direction tensor
    g:      (Cout,)               weight_norm magnitude
    bias:   (Cout,)
    compute_dtype: MXU input dtype (None -> preserve x dtype; use bf16 on
                   v6e/v7x for f32 activations if the accuracy budget allows).
    """
    KH, KW = filter_size
    B, Cin, H, W = x_nchw.shape
    Cout = v.shape[0]
    cdtype = x_nchw.dtype if compute_dtype is None else compute_dtype

    pad_l = (KW - 1) // 2
    pad_r = (KW - 1) // 2
    Wo = W + pad_l + pad_r - KW + 1          # output width (== W for odd KW)
    shift = 1 if shift_output_down else 0
    pad_t = (KH - 1) + shift                 # causal top pad (+1 if shifted)
    Hp = H + pad_t

    N = Wo * Cout
    n_pad = _round_up(N, 128)                # lane-dense output width

    # ---- weight glue (weight-only; cacheable across calls) ----
    w_band, bias_row = _banded_weights(v, g, bias, W=W, Wo=Wo, pad_l=pad_l,
                                       n_pad=n_pad, compute_dtype=cdtype)

    # ---- lane-dense input; only the causal top rows are padded in HBM ----
    x = jnp.transpose(x_nchw, (0, 2, 3, 1)).reshape(B, H, W * Cin)
    x = x.astype(cdtype)
    xp = jnp.pad(x, ((0, 0), (pad_t, 0), (0, 0)))            # (B, Hp, W*Cin)

    # ---- tiling: batch-group x N-tile x row-tile ----
    NB, TH, TN = _pick_tiles(B, H, n_pad)
    grid = (B // NB, n_pad // TN, H // TH)

    # ---- explicit VMEM budget: footprint + headroom, clamped per chip ----
    itemsize = jnp.dtype(cdtype).itemsize
    blk_bytes = 2 * (NB * Hp * W * Cin * itemsize      # x (double buffered)
                     + KH * W * Cin * TN * itemsize    # w_band tile
                     + TN * 4                          # bias tile (f32)
                     + NB * TH * TN * itemsize)        # out tile
    vmem_cap = _vmem_capacity_bytes()
    vmem_limit = int(min(max(blk_bytes + (16 << 20), 32 << 20),
                         (vmem_cap * 3) // 4))

    kernel = functools.partial(_dsconv_kernel, NB=NB, TH=TH, KH=KH, shift=shift)

    out = pl.pallas_call(
        kernel,
        out_shape=jax.ShapeDtypeStruct((B, H, n_pad), cdtype),
        grid=grid,
        in_specs=[
            # Full (top-padded) image for this batch group; block index is
            # constant across the N/row-tile axes so it stays resident in VMEM.
            pl.BlockSpec((NB, Hp, W * Cin), lambda b, n, t: (b, 0, 0)),
            pl.BlockSpec((KH, W * Cin, TN), lambda b, n, t: (0, 0, n)),
            pl.BlockSpec((1, TN), lambda b, n, t: (0, n)),
        ],
        out_specs=pl.BlockSpec((NB, TH, TN), lambda b, n, t: (b, t, n)),
        compiler_params=pltpu.CompilerParams(
            dimension_semantics=("parallel", "parallel", "parallel"),
            vmem_limit_bytes=vmem_limit,
        ),
    )(xp, w_band, bias_row)

    if n_pad != N:
        out = out[..., :N]                               # strip lane padding
    # (B, H, Wo*Cout) -> (B, Cout, H, Wo) to match PyTorch NCHW (layout glue).
    return jnp.transpose(out.reshape(B, H, Wo, Cout), (0, 3, 1, 2))


def _reference_forward(x_nchw, v, g, bias, *, filter_size=(2, 3),
                       shift_output_down=False):
    """Pure-JAX reference using lax.conv_general_dilated (for verification)."""
    KH, KW = filter_size
    v32 = v.astype(jnp.float32)
    v_norm = jnp.sqrt(jnp.sum(v32 * v32, axis=(1, 2, 3)))
    w = v32 * (g.astype(jnp.float32) / v_norm)[:, None, None, None]
    pad_l = (KW - 1) // 2
    out = lax.conv_general_dilated(
        x_nchw.astype(jnp.float32), w, (1, 1),
        padding=((KH - 1, 0), (pad_l, pad_l)),
        dimension_numbers=("NCHW", "OIHW", "NCHW"),
        precision=lax.Precision.HIGHEST)
    out = out + bias.reshape(1, -1, 1, 1)
    if shift_output_down:
        H = out.shape[2]
        out = jnp.pad(out[:, :, :H - 1, :], ((0, 0), (0, 0), (1, 0), (0, 0)))
    return out


if __name__ == "__main__":
    key = jax.random.PRNGKey(0)
    k1, k2, k3, k4 = jax.random.split(key, 4)

    B, Cin, H, W = 2, 4, 16, 16
    Cout = 8
    filter_size = (2, 3)

    x = jax.random.normal(k1, (B, Cin, H, W), dtype=jnp.float32)
    v = jax.random.normal(k2, (Cout, Cin) + filter_size, dtype=jnp.float32) * 0.1
    g = 1.0 + 0.05 * jax.random.normal(k3, (Cout,), dtype=jnp.float32)
    bias = 0.1 * jax.random.normal(k4, (Cout,), dtype=jnp.float32)

    # Tolerance sized for MXU f32 (multi-pass) matmul accumulation vs the
    # HIGHEST-precision XLA conv reference; structural bugs give O(1) diffs.
    TOL = dict(atol=1e-2, rtol=1e-2)

    # default path (shift_output_down=False)
    out = down_shifted_conv2d_forward(x, v, g, bias, filter_size=filter_size,
                                      shift_output_down=False)
    out = jax.block_until_ready(out)
    ref = _reference_forward(x, v, g, bias, filter_size=filter_size,
                             shift_output_down=False)
    assert out.shape == (B, Cout, H, W), out.shape
    assert jnp.allclose(out, ref, **TOL), float(jnp.max(jnp.abs(out - ref)))

    # down_shift path (handled inside the kernel at store time)
    out_s = down_shifted_conv2d_forward(x, v, g, bias, filter_size=filter_size,
                                        shift_output_down=True)
    out_s = jax.block_until_ready(out_s)
    ref_s = _reference_forward(x, v, g, bias, filter_size=filter_size,
                               shift_output_down=True)
    assert jnp.allclose(out_s, ref_s, **TOL), \
        float(jnp.max(jnp.abs(out_s - ref_s)))

    print("KERNEL_OK")
</pallas_src>

<mosaic_0001>
module attributes {stable_mosaic.version = 11 : i64} {
  func.func @_dsconv_kernel(%arg0: i32, %arg1: i32, %arg2: i32, %arg3: memref<2x17x64xf32, #tpu.memory_space<vmem>>, %arg4: memref<2x64x128xf32, #tpu.memory_space<vmem>>, %arg5: memref<1x128xf32, #tpu.memory_space<vmem>>, %arg6: memref<2x16x128xf32, #tpu.memory_space<vmem>>) attributes {dimension_semantics = [#tpu.dimension_semantics<parallel>, #tpu.dimension_semantics<parallel>, #tpu.dimension_semantics<parallel>], iteration_bounds = array<i64: 1, 1, 1>, scalar_prefetch = 0 : i64, scratch_operands = 0 : i64, tpu.core_type = #tpu.core_type<tc>, window_params = [{transform_indices = @transform_0, window_bounds = array<i64: 2, 17, 64>}, {transform_indices = @transform_1, window_bounds = array<i64: 2, 64, 128>}, {transform_indices = @transform_2, window_bounds = array<i64: 1, 128>}, {transform_indices = @transform_3, window_bounds = array<i64: 2, 16, 128>}]} {
    %c16_i32 = arith.constant 16 : i32
    %0 = arith.muli %arg2, %c16_i32 : i32
    %1 = tpu.assume_multiple %0, 16 : i32
    %c0 = arith.constant 0 : index
    %c0_0 = arith.constant 0 : index
    %2 = vector.load %arg5[%c0, %c0_0] : memref<1x128xf32, #tpu.memory_space<vmem>>, vector<1x128xf32>
    %3 = vector.shape_cast %2 : vector<1x128xf32> to vector<1x128xf32>
    %4 = vector.broadcast %3 : vector<1x128xf32> to vector<32x128xf32>
    %c0_i32 = arith.constant 0 : i32
    %5 = arith.addi %1, %c0_i32 : i32
    %c0_1 = arith.constant 0 : index
    %6 = arith.index_cast %5 : i32 to index
    %c0_2 = arith.constant 0 : index
    %7 = vector.load %arg3[%c0_1, %6, %c0_2] : memref<2x17x64xf32, #tpu.memory_space<vmem>>, vector<2x16x64xf32>
    %8 = vector.shape_cast %7 : vector<2x16x64xf32> to vector<32x64xf32>
    %c0_3 = arith.constant 0 : index
    %c0_4 = arith.constant 0 : index
    %c0_5 = arith.constant 0 : index
    %9 = vector.load %arg4[%c0_3, %c0_4, %c0_5] : memref<2x64x128xf32, #tpu.memory_space<vmem>>, vector<1x64x128xf32>
    %10 = vector.shape_cast %9 : vector<1x64x128xf32> to vector<64x128xf32>
    %cst = arith.constant dense<0.000000e+00> : vector<32x128xf32>
    %11 = tpu.matmul %8, %10, %cst {dimension_numbers = #tpu.dot_dimension_numbers<[1], [0], [0], [1], [0, 0, 1, 1], [], []>} : vector<32x64xf32>, vector<64x128xf32>, vector<32x128xf32> -> vector<32x128xf32>
    %12 = arith.addf %4, %11 : vector<32x128xf32>
    %c1_i32 = arith.constant 1 : i32
    %13 = arith.addi %1, %c1_i32 : i32
    %c0_6 = arith.constant 0 : index
    %14 = arith.index_cast %13 : i32 to index
    %c0_7 = arith.constant 0 : index
    %15 = vector.load %arg3[%c0_6, %14, %c0_7] : memref<2x17x64xf32, #tpu.memory_space<vmem>>, vector<2x16x64xf32>
    %16 = vector.shape_cast %15 : vector<2x16x64xf32> to vector<32x64xf32>
    %c1 = arith.constant 1 : index
    %c0_8 = arith.constant 0 : index
    %c0_9 = arith.constant 0 : index
    %17 = vector.load %arg4[%c1, %c0_8, %c0_9] : memref<2x64x128xf32, #tpu.memory_space<vmem>>, vector<1x64x128xf32>
    %18 = vector.shape_cast %17 : vector<1x64x128xf32> to vector<64x128xf32>
    %cst_10 = arith.constant dense<0.000000e+00> : vector<32x128xf32>
    %19 = tpu.matmul %16, %18, %cst_10 {dimension_numbers = #tpu.dot_dimension_numbers<[1], [0], [0], [1], [0, 0, 1, 1], [], []>} : vector<32x64xf32>, vector<64x128xf32>, vector<32x128xf32> -> vector<32x128xf32>
    %20 = arith.addf %12, %19 : vector<32x128xf32>
    %21 = vector.shape_cast %20 : vector<32x128xf32> to vector<2x16x128xf32>
    %c0_11 = arith.constant 0 : index
    %c0_12 = arith.constant 0 : index
    %c0_13 = arith.constant 0 : index
    %22 = vector.load %arg6[%c0_11, %c0_12, %c0_13] : memref<2x16x128xf32, #tpu.memory_space<vmem>>, vector<2x16x128xf32>
    tpu.vector_store %arg6[%c0_11, %c0_12, %c0_13], %21 {strides = array<i32>} : memref<2x16x128xf32, #tpu.memory_space<vmem>>, vector<2x16x128xf32>,
    return
  }
  func.func @transform_0(%arg0: i32, %arg1: i32, %arg2: i32) -> (i32, i32, i32) {
    %c0_i32 = arith.constant 0 : i32
    %c0_i32_0 = arith.constant 0 : i32
    %c0_i32_1 = arith.constant 0 : i32
    return %arg0, %c0_i32, %c0_i32_0 : i32, i32, i32
  }
  func.func @transform_1(%arg0: i32, %arg1: i32, %arg2: i32) -> (i32, i32, i32) {
    %c0_i32 = arith.constant 0 : i32
    %c0_i32_0 = arith.constant 0 : i32
    %c0_i32_1 = arith.constant 0 : i32
    return %c0_i32, %c0_i32_0, %arg1 : i32, i32, i32
  }
  func.func @transform_2(%arg0: i32, %arg1: i32, %arg2: i32) -> (i32, i32) {
    %c0_i32 = arith.constant 0 : i32
    %c0_i32_0 = arith.constant 0 : i32
    return %c0_i32, %arg1 : i32, i32
  }
  func.func @transform_3(%arg0: i32, %arg1: i32, %arg2: i32) -> (i32, i32, i32) {
    %c0_i32 = arith.constant 0 : i32
    return %arg0, %arg2, %arg1 : i32, i32, i32
  }
}

</mosaic_0001>

<bundles_post_ra>
// kernel: tpu_custom_call.1
= control target key start
LH: loop header
LB: loop body
LE: loop exit
PB: predicated region body
PF: predicated region fallthrough
CT: control target
= control target key end

     0   :  { %8 = vsyncpa [#allocation3], 0  ;;  %s552_s0 = inlined_call_operand.vmem [shape: f32[2,17,64], index: 0, kind: input, shape index: {}]   ;;  %s553_s1 = inlined_call_operand.hbm [shape: f32[2,64,128], index: 1, kind: input, shape index: {}]   ;;  %s554_s2 = inlined_call_operand.vmem [shape: f32[1,128], index: 2, kind: input, shape index: {}]   ;;  %s555_s3 = inlined_call_operand.hbm [shape: f32[2,16,128], index: 3, kind: output, shape index: {}]  }
   0x1   :  { %9 = vsyncpa [#allocation4], 0  ;;  %s463_s12 = smov [#allocation2]   ;;  %s415_s16 = scalar_lea.hbm %s553_s1, 2048 }
   0x2   :  { %s17_s13 = sshll.u32 %s463_s12, 4  ;;  %p416_p0 = scmp.ne.s32.totalorder %s553_s1, %s415_s16  ;;  %s18_s13 = int_to_ptr.vmem [resolvable:$true] %s17_s13 }
   0x3   :  { %p419_p1 = scmp.lt.u32.totalorder %s415_s16, %s553_s1 }
   0x5   :  { %p421_p2 = pnand %p419_p1, %p416_p0 }
   0x7   :  { %424 = shalt.err (!%p421_p2)
}
   0x8   :  { %s425_s21 = scalar_lea.vmem %s18_s13, 2048  ;;  %p430_p4 = scmp.lt.s32.totalorder %s18_s13, %s18_s13 }
   0x9   :  { %p426_p3 = scmp.ne.s32.totalorder %s18_s13, %s425_s21  ;;  %p431_p5 = scmp.lt.s32.totalorder %s425_s21, %s425_s21 }
   0xb   :  { %p432_p6 = por %p431_p5, %p430_p4 }
   0xd   :  { %p433_p7 = pnand %p432_p6, %p426_p3 }
   0xf   :  { %436 = shalt.err (!%p433_p7)
}
  0x10   :  { %s464_s22 = smov 128   ;;  %s465_s23 = smov 8  }
  0x11   :  { %23 = dma.hbm_to_vmem [thread:$0]  %s553_s1, 2048, %s18_s13, [#allocation3], %s464_s22, %s464_s22, %s465_s23  }
  0x12   :  { %459 = dma.done.wait [#allocation3], 2048  }
  0x13   :  { %460 = vsyncadd [#allocation3], 4294965248  ;;  %v42_v0 = vld [vmem:[#allocation2] sm:$0xff]  ;;  %v43_v1 = vld [vmem:[#allocation2 + $0x8] sm:$0xff]  ;;  %vm50_vm0 = vcmask 523264  }
  0x14   :  { %v159_v2 = vld [vmem:[#allocation2 + $0x40] sm:$0xff]  ;;  %v371_v3 = vpack.c.bf16 %v43_v1, %v42_v0  ;;  %v160_v4 = vld [vmem:[#allocation2 + $0x48] sm:$0xff]  ;;  %v44_v5 = vld [vmem:[#allocation2 + $0x10] sm:$0xff] }
  0x15   :  { %v45_v6 = vld [vmem:[#allocation2 + $0x18] sm:$0xff]  ;;  %v387_v7 = vpack.c.bf16 %v160_v4, %v159_v2  ;;  %v161_v9 = vld [vmem:[#allocation2 + $0x50] sm:$0xff]  ;;  %v46_v11 = vld [vmem:[#allocation2 + $0x20] sm:$0xff] }
  0x16   :  { %v375_v8 = vpack.c.bf16 %v45_v6, %v44_v5  ;;  %v162_v10 = vld [vmem:[#allocation2 + $0x58] sm:$0xff]  ;;  %372 = vmatprep.subr.bf16.mxu1 %v371_v3  ;;  %v47_v13 = vld [vmem:[#allocation2 + $0x28] sm:$0xff]  ;;  %v163_v14 = vld [vmem:[#allocation2 + $0x60] sm:$0xff] }
  0x17   :  { %v391_v12 = vpack.c.bf16 %v162_v10, %v161_v9  ;;  %v164_v15 = vld [vmem:[#allocation2 + $0x68] sm:$0xff]  ;;  %374 = vmatpush3.bf16.msra.mxu1 %v371_v3  ;;  %388 = vmatprep.subr.bf16.mxu0 %v387_v7  ;;  %v379_v16 = vpack.c.bf16 %v47_v13, %v46_v11  ;;  %v38_v17 = vld [vmem:[%s552_s0] sm:$0xff]  ;;  %v49_v20 = vld [vmem:[#allocation2 + $0x38] sm:$0xff] }
  0x18   :  { %390 = vmatpush3.bf16.msra.mxu0 %v387_v7  ;;  %376 = vmatprep.subr.bf16.mxu1 %v375_v8  ;;  %v395_v18 = vpack.c.bf16 %v164_v15, %v163_v14  ;;  %v48_v19 = vld [vmem:[#allocation2 + $0x30] sm:$0xff]  ;;  %v166_v23 = vld [vmem:[#allocation2 + $0x78] sm:$0xff]  ;;  %v40_v28 = vld [vmem:[%s552_s0 + $0x18] sm:$0xff] }
  0x19   :  { %392 = vmatprep.subr.bf16.mxu0 %v391_v12  ;;  %343 = vmatprep.mubr.msk.f32.mxu1 %vm50_vm0, %v38_v17  ;;  %v295_v21 = vld [vmem:[%s552_s0 + $0x1] sm:$0xff]  ;;  %v383_v24 = vpack.c.bf16 %v49_v20, %v48_v19  ;;  %v296_v27 = vld [vmem:[%s552_s0 + $0x9] sm:$0xff]  ;;  %v297_v29 = vld [vmem:[%s552_s0 + $0x19] sm:$0xff] }
  0x1a   :  { %v165_v22 = vld [vmem:[#allocation2 + $0x70] sm:$0xff]  ;;  %365 = vmatprep.mubr.msk.f32.mxu0 %vm50_vm0, %v295_v21  ;;  %v39_v26 = vld [vmem:[%s552_s0 + $0x8] sm:$0xff] }
  0x1b   :  { %378 = vmatpush3.bf16.msra.mxu1 %v375_v8  ;;  %v399_v25 = vpack.c.bf16 %v166_v23, %v165_v22  ;;  %v41_v30 = vld [vmem:[%s552_s0 + $0x20] sm:$0xff] }
  0x1c   :  { %394 = vmatpush3.bf16.msra.mxu0 %v391_v12  ;;  %380 = vmatprep.subr.bf16.mxu1 %v379_v16  ;;  %v298_v31 = vld [vmem:[%s552_s0 + $0x21] sm:$0xff]  ;;  %v290_v32 = vld [vmem:[%s554_s2] ss:$0 sm:$0xff]  ;;  %s466_s0 = smov [#allocation5]  }
  0x1d   :  { %396 = vmatprep.subr.bf16.mxu0 %v395_v18  ;;  %s277_s16 = sshll.u32 %s466_s0, 4  ;;  %s278_s16 = int_to_ptr.vmem [resolvable:$true] %s277_s16 }
  0x1e   :  { %s437_s2 = scalar_lea.vmem %s278_s16, 512  ;;  %p442_p9 = scmp.lt.s32.totalorder %s278_s16, %s278_s16 }
  0x1f   :  { %382 = vmatpush3.bf16.msra.mxu1 %v379_v16  ;;  %p438_p8 = scmp.ne.s32.totalorder %s278_s16, %s437_s2  ;;  %p443_p10 = scmp.lt.s32.totalorder %s437_s2, %s437_s2 }
  0x20   :  { %398 = vmatpush3.bf16.msra.mxu0 %v395_v18  ;;  %384 = vmatprep.subr.bf16.mxu1 %v383_v24 }
  0x21   :  { %400 = vmatprep.subr.bf16.mxu0 %v399_v25  ;;  %p444_p11 = por %p443_p10, %p442_p9 }
  0x23   :  { %386 = vmatpush3.bf16.msra.mxu1 %v383_v24  ;;  %p445_p12 = pnand %p444_p11, %p438_p8 }
  0x24   :  { %402 = vmatpush3.bf16.msra.mxu0 %v399_v25 }
  0x26   :  { %344 = vmatmul.mubr.msk.f32.vlgmr.msra.gmra.mrb[0].mxu1 %vm50_vm0, %v39_v26 }
  0x27   :  { %366 = vmatmul.mubr.msk.f32.vlgmr.msra.gmra.mrb[0].mxu0 %vm50_vm0, %v296_v27  ;;  %346 = vmatprep.mubr.msk.f32.mxu1 %vm50_vm0, %v40_v28 }
  0x28   :  { %368 = vmatprep.mubr.msk.f32.mxu0 %vm50_vm0, %v297_v29 }
  0x2a   :  { %347 = vmatmul.mubr.msk.f32.gmra.mrb[2].mxu1 %vm50_vm0, %v41_v30 }
  0x2b   :  { %369 = vmatmul.mubr.msk.f32.gmra.mrb[2].mxu0 %vm50_vm0, %v298_v31 }
  0xf9   :  { %v345_v33 = vpop.f32.mrb[0].mxu1 }
  0xfa   :  { %v149_v34 = vadd.f32 %v345_v33, %v290_v32  ;;  %v129_v35 = vpop.f32.mrb[1].mxu1  ;;  %v367_v36 = vpop.f32.mrb[0].mxu0 }
  0xfb   :  { %v148_v37 = vadd.f32 %v290_v32, %v129_v35  ;;  %v245_v38 = vpop.f32.mrb[1].mxu0 }
  0xfc   :  { %v265_v39 = vadd.f32 %v367_v36, %v149_v34 }
  0xfd   :  { %v264_v40 = vadd.f32 %v245_v38, %v148_v37  ;;  %v348_v41 = vpop.f32.mrb[2].mxu1 }
  0xfe   :  { %269 = vst [vmem:[#allocation5 + $0x8] sm:$0xff] %v265_v39  ;;  %v151_v42 = vadd.f32 %v348_v41, %v290_v32  ;;  %v139_v43 = vpop.f32.mrb[3].mxu1  ;;  %v370_v44 = vpop.f32.mrb[2].mxu0 }
  0xff   :  { %268 = vst [vmem:[#allocation5] sm:$0xff] %v264_v40  ;;  %v150_v45 = vadd.f32 %v290_v32, %v139_v43  ;;  %v255_v46 = vpop.f32.mrb[3].mxu0 }
 0x100   :  { %v267_v47 = vadd.f32 %v370_v44, %v151_v42 }
 0x101   :  { %v266_v48 = vadd.f32 %v255_v46, %v150_v45 }
 0x102   :  { %271 = vst [vmem:[#allocation5 + $0x18] sm:$0xff] %v267_v47 }
 0x103   :  { %270 = vst [vmem:[#allocation5 + $0x10] sm:$0xff] %v266_v48 }
 0x104   :  { %448 = shalt.err (!%p445_p12)
}
 0x105   :  { %s449_s19 = scalar_lea.hbm %s555_s3, 512 }
 0x106   :  { %p450_p13 = scmp.ne.s32.totalorder %s555_s3, %s449_s19  ;;  %p453_p0 = scmp.lt.u32.totalorder %s449_s19, %s555_s3 }
 0x108   :  { %p455_p1 = pnand %p453_p0, %p450_p13 }
 0x10a   :  { %458 = shalt.err (!%p455_p1)
}
 0x10b   :  { %283 = dma.vmem_to_hbm [thread:$0]  %s278_s16, 512, %s555_s3, [#allocation4], %s464_s22, %s464_s22, %s465_s23  }
 0x10c   :  { %461 = dma.done.wait [#allocation4], 512  }
 0x10d   :  { %462 = vsyncadd [#allocation4], 4294966784 }
 0x10e   :  { %287 = vsyncpa [#allocation3], 1 }
 0x10f   :  { %288 = vsyncpa [#allocation4], 1 }

</bundles_post_ra>
